<compile_context>
chip_gen: v7x
topology: tpu7x:2x2x1
jax: 0.10.0
libtpu: 0.0.40
codegen_flags: <defaults>
</compile_context>

<pallas_src>
import jax
import jax.numpy as jnp
from jax.experimental import pallas as pl
from jax.experimental.pallas import tpu as pltpu

_SUBLANE = 8
_SMALL_B_CUTOFF = 512          # below this, a single full-batch tile is best
_VMEM_BUDGET = 24 * 1024 * 1024   # conservative per-step budget (fits v7x)
_VMEM_LIMIT = 32 * 1024 * 1024    # explicit scoped-VMEM limit (ok on v5e/v6e/v7x)


def classifier_kernel(x_ref, w1_ref, b1_ref, w2_ref, b2_ref, o_ref):
    """Fused 2-layer MLP: out = relu(x @ w1 + b1) @ w2 + b2.

    Dropout(p=0.1) is identity in eval mode, so it is omitted on the hot path.
    Rows are fully independent, so garbage rows in a ragged last batch tile
    only produce garbage output rows, which Pallas masks out on store.
    """
    h = jnp.dot(x_ref[...], w1_ref[...], preferred_element_type=jnp.float32)
    h = jnp.maximum(h + b1_ref[...], 0.0)          # broadcast [1, H] over [tb, H]
    # TODO(synk): training-mode dropout would need pltpu.prng_random_bits; eval mode is identity.
    out = jnp.dot(h, w2_ref[...], preferred_element_type=jnp.float32)
    o_ref[...] = (out + b2_ref[...]).astype(o_ref.dtype)


def _round_up(v, m):
    return ((v + m - 1) // m) * m


def _pick_tile_b(B, d_in, d_hid, n_out, max_tile_b):
    """Choose the batch tile size.

    Small B  -> one full-batch tile (full-array block shape, no padding rules).
    Large B  -> >=2 grid steps (v7x megacore), tile_b a multiple of 8, capped
                by a simple double-buffered VMEM estimate.
    """
    if B <= _SMALL_B_CUTOFF:
        return B

    tile_b = min(max_tile_b, _round_up(pl.cdiv(B, 2), _SUBLANE))

    def vmem_bytes(tb):
        return (2 * tb * d_in * 4          # double-buffered x tiles
                + 2 * tb * n_out * 4       # double-buffered output tiles
                + d_in * d_hid * 4         # resident w1
                + d_hid * n_out * 4        # resident w2
                + (d_hid + n_out) * 4)     # biases

    while tile_b > _SUBLANE and vmem_bytes(tile_b) > _VMEM_BUDGET:
        tile_b = max(_SUBLANE, _round_up(tile_b // 2, _SUBLANE))
    return tile_b


def classifier_forward(x, w1, b1, w2, b2, *, max_tile_b=2048):
    """Run the fused classifier kernel.

    x : [B, input_dim] float32
    w1: [input_dim, hidden_dim], b1: [hidden_dim]
    w2: [hidden_dim, 3],         b2: [3]
    returns logits [B, 3] float32
    """
    B, d_in = x.shape
    d_hid = w1.shape[1]
    n_out = w2.shape[1]

    # Biases as [1, N] rows (free metadata reshape; no data movement).
    b1_2d = jnp.reshape(b1, (1, d_hid))
    b2_2d = jnp.reshape(b2, (1, n_out))

    tile_b = _pick_tile_b(B, d_in, d_hid, n_out, max_tile_b)
    grid = (pl.cdiv(B, tile_b),)

    out = pl.pallas_call(
        classifier_kernel,
        out_shape=jax.ShapeDtypeStruct((B, n_out), jnp.float32),
        grid_spec=pl.GridSpec(
            grid=grid,
            in_specs=[
                # x: tile over batch, full feature width (last dim == array dim).
                pl.BlockSpec((tile_b, d_in), lambda i: (i, 0)),
                # weights / biases: full-array blocks, constant index_map ->
                # VMEM-resident across all grid steps.
                pl.BlockSpec((d_in, d_hid), lambda i: (0, 0)),
                pl.BlockSpec((1, d_hid), lambda i: (0, 0)),
                pl.BlockSpec((d_hid, n_out), lambda i: (0, 0)),
                pl.BlockSpec((1, n_out), lambda i: (0, 0)),
            ],
            # logits written directly at their real width (masked vst, but
            # 12 B/row of HBM traffic instead of 512 B/row of padded f32).
            out_specs=pl.BlockSpec((tile_b, n_out), lambda i: (i, 0)),
        ),
        compiler_params=pltpu.CompilerParams(
            dimension_semantics=("parallel",),
            vmem_limit_bytes=_VMEM_LIMIT,
        ),
    )(x, w1, b1_2d, w2, b2_2d)

    return out


def _reference(x, w1, b1, w2, b2):
    return jnp.maximum(x @ w1 + b1, 0.0) @ w2 + b2


if __name__ == "__main__":
    key = jax.random.PRNGKey(0)
    k_x, k_w1, k_b1, k_w2, k_b2, k_x2 = jax.random.split(key, 6)

    # Small shapes consistent with the module: Linear(input_dim, hidden) -> ReLU -> Linear(hidden, 3)
    B, INPUT_DIM, HIDDEN_DIM, N_CLASSES = 16, 32, 32, 3

    x = jax.random.normal(k_x, (B, INPUT_DIM), dtype=jnp.float32)
    # Deterministic synthetic parameters (shapes from the module's __init__),
    # stored as [in, out] (PyTorch weight.T) with 1-D biases.
    w1 = jax.random.normal(k_w1, (INPUT_DIM, HIDDEN_DIM), dtype=jnp.float32) * 0.05
    b1 = jax.random.normal(k_b1, (HIDDEN_DIM,), dtype=jnp.float32) * 0.01
    w2 = jax.random.normal(k_w2, (HIDDEN_DIM, N_CLASSES), dtype=jnp.float32) * 0.05
    b2 = jax.random.normal(k_b2, (N_CLASSES,), dtype=jnp.float32) * 0.01

    # Single-tile (small batch) path.
    logits = jax.block_until_ready(classifier_forward(x, w1, b1, w2, b2))
    ref = _reference(x, w1, b1, w2, b2)
    assert logits.shape == (B, N_CLASSES)
    assert jnp.allclose(logits, ref, atol=1e-4, rtol=1e-4)

    # Multi-step grid with a ragged last batch tile (exercises masked output
    # writes on the un-padded path).
    B2 = 530
    x2 = jax.random.normal(k_x2, (B2, INPUT_DIM), dtype=jnp.float32)
    logits2 = jax.block_until_ready(classifier_forward(x2, w1, b1, w2, b2))
    ref2 = _reference(x2, w1, b1, w2, b2)
    assert logits2.shape == (B2, N_CLASSES)
    assert jnp.allclose(logits2, ref2, atol=1e-4, rtol=1e-4)

    print("KERNEL_OK")
</pallas_src>

<mosaic_0001>
module attributes {stable_mosaic.version = 11 : i64} {
  func.func @classifier_kernel(%arg0: i32, %arg1: memref<16x32xf32, #tpu.memory_space<vmem>>, %arg2: memref<32x32xf32, #tpu.memory_space<vmem>>, %arg3: memref<1x32xf32, #tpu.memory_space<vmem>>, %arg4: memref<32x3xf32, #tpu.memory_space<vmem>>, %arg5: memref<1x3xf32, #tpu.memory_space<vmem>>, %arg6: memref<16x3xf32, #tpu.memory_space<vmem>>) attributes {dimension_semantics = [#tpu.dimension_semantics<parallel>], iteration_bounds = array<i64: 1>, scalar_prefetch = 0 : i64, scratch_operands = 0 : i64, tpu.core_type = #tpu.core_type<tc>, window_params = [{transform_indices = @transform_0, window_bounds = array<i64: 16, 32>}, {pipeline_mode = #tpu.pipeline_mode<synchronous>, transform_indices = @transform_1, window_bounds = array<i64: 32, 32>}, {pipeline_mode = #tpu.pipeline_mode<synchronous>, transform_indices = @transform_2, window_bounds = array<i64: 1, 32>}, {pipeline_mode = #tpu.pipeline_mode<synchronous>, transform_indices = @transform_3, window_bounds = array<i64: 32, 3>}, {pipeline_mode = #tpu.pipeline_mode<synchronous>, transform_indices = @transform_4, window_bounds = array<i64: 1, 3>}, {transform_indices = @transform_5, window_bounds = array<i64: 16, 3>}]} {
    %c0 = arith.constant 0 : index
    %c0_0 = arith.constant 0 : index
    %0 = vector.load %arg1[%c0, %c0_0] : memref<16x32xf32, #tpu.memory_space<vmem>>, vector<16x32xf32>
    %c0_1 = arith.constant 0 : index
    %c0_2 = arith.constant 0 : index
    %1 = vector.load %arg2[%c0_1, %c0_2] : memref<32x32xf32, #tpu.memory_space<vmem>>, vector<32x32xf32>
    %cst = arith.constant dense<0.000000e+00> : vector<16x32xf32>
    %2 = tpu.matmul %0, %1, %cst {dimension_numbers = #tpu.dot_dimension_numbers<[1], [0], [0], [1], [0, 0, 1, 1], [], []>} : vector<16x32xf32>, vector<32x32xf32>, vector<16x32xf32> -> vector<16x32xf32>
    %c0_3 = arith.constant 0 : index
    %c0_4 = arith.constant 0 : index
    %3 = vector.load %arg3[%c0_3, %c0_4] : memref<1x32xf32, #tpu.memory_space<vmem>>, vector<1x32xf32>
    %4 = vector.broadcast %3 : vector<1x32xf32> to vector<16x32xf32>
    %5 = arith.addf %2, %4 : vector<16x32xf32>
    %cst_5 = arith.constant 0.000000e+00 : f32
    %6 = vector.broadcast %cst_5 : f32 to vector<16x32xf32>
    %7 = arith.maximumf %5, %6 : vector<16x32xf32>
    %c0_6 = arith.constant 0 : index
    %c0_7 = arith.constant 0 : index
    %8 = vector.load %arg4[%c0_6, %c0_7] : memref<32x3xf32, #tpu.memory_space<vmem>>, vector<32x3xf32>
    %cst_8 = arith.constant dense<0.000000e+00> : vector<16x3xf32>
    %9 = tpu.matmul %7, %8, %cst_8 {dimension_numbers = #tpu.dot_dimension_numbers<[1], [0], [0], [1], [0, 0, 1, 1], [], []>} : vector<16x32xf32>, vector<32x3xf32>, vector<16x3xf32> -> vector<16x3xf32>
    %c0_9 = arith.constant 0 : index
    %c0_10 = arith.constant 0 : index
    %10 = vector.load %arg5[%c0_9, %c0_10] : memref<1x3xf32, #tpu.memory_space<vmem>>, vector<1x3xf32>
    %11 = vector.broadcast %10 : vector<1x3xf32> to vector<16x3xf32>
    %12 = arith.addf %9, %11 : vector<16x3xf32>
    %c0_11 = arith.constant 0 : index
    %c0_12 = arith.constant 0 : index
    %13 = vector.load %arg6[%c0_11, %c0_12] : memref<16x3xf32, #tpu.memory_space<vmem>>, vector<16x3xf32>
    tpu.vector_store %arg6[%c0_11, %c0_12], %12 {strides = array<i32>} : memref<16x3xf32, #tpu.memory_space<vmem>>, vector<16x3xf32>,
    return
  }
  func.func @transform_0(%arg0: i32) -> (i32, i32) {
    %c0_i32 = arith.constant 0 : i32
    %c0_i32_0 = arith.constant 0 : i32
    return %arg0, %c0_i32 : i32, i32
  }
  func.func @transform_1(%arg0: i32) -> (i32, i32) {
    %c0_i32 = arith.constant 0 : i32
    %c0_i32_0 = arith.constant 0 : i32
    %c0_i32_1 = arith.constant 0 : i32
    return %c0_i32, %c0_i32_0 : i32, i32
  }
  func.func @transform_2(%arg0: i32) -> (i32, i32) {
    %c0_i32 = arith.constant 0 : i32
    %c0_i32_0 = arith.constant 0 : i32
    %c0_i32_1 = arith.constant 0 : i32
    return %c0_i32, %c0_i32_0 : i32, i32
  }
  func.func @transform_3(%arg0: i32) -> (i32, i32) {
    %c0_i32 = arith.constant 0 : i32
    %c0_i32_0 = arith.constant 0 : i32
    %c0_i32_1 = arith.constant 0 : i32
    return %c0_i32, %c0_i32_0 : i32, i32
  }
  func.func @transform_4(%arg0: i32) -> (i32, i32) {
    %c0_i32 = arith.constant 0 : i32
    %c0_i32_0 = arith.constant 0 : i32
    %c0_i32_1 = arith.constant 0 : i32
    return %c0_i32, %c0_i32_0 : i32, i32
  }
  func.func @transform_5(%arg0: i32) -> (i32, i32) {
    %c0_i32 = arith.constant 0 : i32
    %c0_i32_0 = arith.constant 0 : i32
    return %arg0, %c0_i32 : i32, i32
  }
}

</mosaic_0001>

<bundles_post_ra>
// kernel: tpu_custom_call.1
= control target key start
LH: loop header
LB: loop body
LE: loop exit
PB: predicated region body
PF: predicated region fallthrough
CT: control target
= control target key end

     0   :  { %10 = vsyncpa [#allocation3], 0  ;;  %s314_s18 = smov [#allocation2]   ;;  %s399_s0 = inlined_call_operand.hbm [shape: f32[16,32], index: 0, kind: input, shape index: {}]   ;;  %s400_s1 = inlined_call_operand.vmem [shape: f32[32,32], index: 1, kind: input, shape index: {}]   ;;  %s401_s2 = inlined_call_operand.vmem [shape: f32[1,32], index: 2, kind: input, shape index: {}]   ;;  %s402_s3 = inlined_call_operand.vmem [shape: f32[32,3], index: 3, kind: input, shape index: {}]   ;;  %s403_s4 = inlined_call_operand.vmem [shape: f32[1,3], index: 4, kind: input, shape index: {}]   ;;  %s404_s5 = inlined_call_operand.vmem [shape: f32[16,3], index: 5, kind: output, shape index: {}]  }
   0x1   :  { %s16_s19 = sshll.u32 %s314_s18, 4  ;;  %s290_s22 = scalar_lea.hbm %s399_s0, 256  ;;  %s17_s19 = int_to_ptr.vmem [resolvable:$true] %s16_s19 }
   0x2   :  { %p291_p0 = scmp.ne.s32.totalorder %s399_s0, %s290_s22  ;;  %p294_p1 = scmp.lt.u32.totalorder %s290_s22, %s399_s0 }
   0x4   :  { %p296_p2 = pnand %p294_p1, %p291_p0 }
   0x6   :  { %299 = shalt.err (!%p296_p2)
}
   0x7   :  { %s300_s27 = scalar_lea.vmem %s17_s19, 256  ;;  %p305_p4 = scmp.lt.s32.totalorder %s17_s19, %s17_s19 }
   0x8   :  { %p301_p3 = scmp.ne.s32.totalorder %s17_s19, %s300_s27  ;;  %p306_p5 = scmp.lt.s32.totalorder %s300_s27, %s300_s27 }
   0xa   :  { %p307_p6 = por %p306_p5, %p305_p4 }
   0xc   :  { %p308_p7 = pnand %p307_p6, %p301_p3 }
   0xe   :  { %311 = shalt.err (!%p308_p7)
}
   0xf   :  { %s315_s28 = smov 128   ;;  %s316_s29 = smov 8  }
  0x10   :  { %22 = dma.hbm_to_vmem [thread:$0]  %s399_s0, 256, %s17_s19, [#allocation3], %s315_s28, %s315_s28, %s316_s29  }
  0x11   :  { %312 = dma.done.wait [#allocation3], 256  }
  0x12   :  { %313 = vsyncadd [#allocation3], 4294967040  ;;  %vm47_vm0 = vcmask 261120   ;;  %v36_v0 = vld [vmem:[%s400_s1] sm:$0xff]  ;;  %v37_v1 = vld [vmem:[%s400_s1 + $0x8] sm:$0xff]  ;;  %vm223_vm1 = vcmask 23552  }
  0x13   :  { %v38_v2 = vld [vmem:[%s400_s1 + $0x10] sm:$0xff]  ;;  %v271_v3 = vpack.c.bf16 %v37_v1, %v36_v0  ;;  %v39_v4 = vld [vmem:[%s400_s1 + $0x18] sm:$0xff]  ;;  %v34_v5 = vld [vmem:[#allocation2] sm:$0xff] }
  0x14   :  { %v275_v6 = vpack.c.bf16 %v39_v4, %v38_v2  ;;  %257 = vmatprep.mubr.msk.f32.mxu0 %vm47_vm0, %v34_v5  ;;  %v131_v7 = vld [vmem:[%s402_s3] sm:$0xff]  ;;  %v132_v8 = vld [vmem:[%s402_s3 + $0x8] sm:$0xff]  ;;  %v133_v11 = vld [vmem:[%s402_s3 + $0x10] sm:$0xff] }
  0x15   :  { %272 = vmatprep.subr.bf16.mxu0 %v271_v3  ;;  %v279_v9 = vpack.c.bf16 %v132_v8, %v131_v7  ;;  %v35_v10 = vld [vmem:[#allocation2 + $0x8] sm:$0xff]  ;;  %v134_v12 = vld [vmem:[%s402_s3 + $0x18] sm:$0xff]  ;;  %v231_v14 = vld [vmem:[%s401_s2] ss:$0 sm:$0xff] }
  0x16   :  { %274 = vmatpush3.bf16.msra.mxu0 %v271_v3  ;;  %v283_v13 = vpack.c.bf16 %v134_v12, %v133_v11  ;;  %v234_v21 = vld [vmem:[%s403_s4] ss:$0 sm:$0xff] }
  0x17   :  { %276 = vmatprep.subr.bf16.mxu0 %v275_v6  ;;  %280 = vmatprep.subr.bf16.mxu1 %v279_v9 }
  0x18   :  { %282 = vmatpush3.bf16.msra.mxu1 %v279_v9 }
  0x19   :  { %284 = vmatprep.subr.bf16.mxu1 %v283_v13 }
  0x1a   :  { %278 = vmatpush3.bf16.msra.mxu0 %v275_v6 }
  0x1c   :  { %286 = vmatpush3.bf16.msra.mxu1 %v283_v13 }
  0x1d   :  { %258 = vmatmul.mubr.msk.f32.vlgmr.msra.gmra.mrb[0].mxu0 %vm47_vm0, %v35_v10 }
  0xf0   :  { %v259_v15 = vpop.f32.mrb[0].mxu0 }
  0xf1   :  { %v126_v16 = vadd.f32 %v259_v15, %v231_v14  ;;  %v120_v17 = vpop.f32.mrb[1].mxu0 }
  0xf2   :  { %v121_v18 = vadd.f32 %v231_v14, %v120_v17 }
  0xf3   :  { %v130_v20 = vmax.f32 %v126_v16, 0.0 }
  0xf4   :  { %v129_v19 = vmax.f32 %v121_v18, 0.0 }
  0xf6   :  { %268 = vmatprep.mubr.msk.f32.mxu1 %vm47_vm0, %v129_v19 }
  0xf7   :  { %269 = vmatmul.mubr.msk.f32.vlgmr.msra.gmra.mrb[0].mxu1 %vm47_vm0, %v130_v20 }
 0x1ca   :  { %v270_v22 = vpop.f32.mrb[0].mxu1 }
 0x1cb   :  { %v220_v23 = vadd.f32 %v270_v22, %v234_v21  ;;  %v214_v24 = vpop.f32.mrb[1].mxu1 }
 0x1cc   :  { %v215_v25 = vadd.f32 %v234_v21, %v214_v24 }
 0x1cd   :  { %225 = vst.msk [vmem:[%s404_s5 + $0x8] sm:$0xff] %vm223_vm1, %v220_v23 }
 0x1ce   :  { %224 = vst.msk [vmem:[%s404_s5] sm:$0xff] %vm223_vm1, %v215_v25 }
 0x1cf   :  { %230 = vsyncpa [#allocation3], 1 }

</bundles_post_ra>
